<compile_context>
chip_gen: v7x
topology: tpu7x:2x2x1
jax: 0.10.0
libtpu: 0.0.40
codegen_flags: <defaults>
</compile_context>

<pallas_src>
import functools

import jax
import jax.numpy as jnp
import numpy as np
from jax.experimental import pallas as pl
from jax.experimental.pallas import tpu as pltpu

BN_EPS = 1e-5


def residual_block_kernel(B, L, C, K1, K2,
                          xp_ref, w1_ref, w2_ref, cb_ref, fs_ref, fb_ref,
                          out_ref):
    """Fused ResidualBlock forward, NCL layout (L on lanes).

    xp_ref : [B, C, L + 2*(P1+P2)]  wrap-padded input (halo built in the wrapper)
    w1_ref : [C, K1*C]              conv1 weight, im2col order (m = k*C + i)
    w2_ref : [C, K2*C]              conv2 weight, im2col order
    cb_ref : [2, C, 1]              conv biases (row 0 -> conv1, row 1 -> conv2)
    fs_ref : [3, B, C, 1]           effective FiLM scales (BN gamma folded in)
    fb_ref : [3, B, C, 1]           effective FiLM biases (BN beta  folded in)
    out_ref: [B, C, L]
    """
    P1, P2 = K1 // 2, K2 // 2
    H = P1 + P2
    xp = xp_ref[...]                                           # [B, C, L+2H] f32

    def valid_conv(h, w_ref, bias, K, l_out):
        # im2col: K static lane-offset slices, one sublane-axis concat, and one
        # batched MXU contraction (no per-tap accumulation chain, no wrap logic).
        taps = [h[:, :, k:k + l_out] for k in range(K)]
        r = jnp.concatenate(taps, axis=1)                      # [B, K*C, l_out]
        w = jnp.broadcast_to(w_ref[...][None], (B, C, K * C))  # [B, C_out, K*C]
        y = jnp.einsum('bom,bml->bol', w, r,
                       preferred_element_type=jnp.float32)     # [B, C_out, l_out]
        return y + bias                                        # bias: [C, 1]

    def film(h, idx, c0, c1):
        # Training-mode BatchNorm1d over (B, L): statistics from the valid center
        # columns [c0:c1] (halo columns are duplicates), two-pass variance, then
        # the folded per-(batch, channel) FiLM affine broadcast along lanes.
        hc = h[:, :, c0:c1]
        inv_n = 1.0 / float(hc.shape[0] * hc.shape[2])
        s = jnp.sum(hc, axis=2, keepdims=True)                 # lane reduce [B,C,1]
        mean = jnp.sum(s, axis=0, keepdims=True) * inv_n       # [1, C, 1]
        d = hc - mean
        s2 = jnp.sum(d * d, axis=2, keepdims=True)
        var = jnp.sum(s2, axis=0, keepdims=True) * inv_n       # [1, C, 1]
        inv_std = jax.lax.rsqrt(var + BN_EPS)
        return (h - mean) * inv_std * fs_ref[idx] + fb_ref[idx]

    # conv1 -> tanh -> FiLM1 computed on the extended domain [B, C, L+2*P2] so
    # that conv2 needs no in-kernel circular wrap.
    h = valid_conv(xp, w1_ref, cb_ref[0], K1, L + 2 * P2)
    h = jnp.tanh(h)
    h = film(h, 0, P2, P2 + L)
    # dropout1: identity (eval mode)
    h = valid_conv(h, w2_ref, cb_ref[1], K2, L)                # [B, C, L]
    h = jnp.tanh(h)
    h = film(h, 1, 0, L)
    # dropout2: identity (eval mode)
    res = film(xp[:, :, H:H + L], 2, 0, L)                     # residual path
    out_ref[...] = (res + h).astype(out_ref.dtype)


def residual_block_forward(x_ncl, time, epsilons, params):
    """x_ncl: [B, C, L] (PyTorch NCL), time/epsilons: [B]. Returns [B, C, L]."""
    B, C, L = x_ncl.shape
    K1 = params['conv1_w'].shape[-1]
    K2 = params['conv2_w'].shape[-1]
    P1, P2 = K1 // 2, K2 // 2
    H = P1 + P2
    hi = jax.lax.Precision.HIGHEST

    # Circular halo built once, outside the kernel; both convs become VALID convs
    # on the extended domain (no wrap concat inside the kernel).
    xp = jnp.pad(x_ncl.astype(jnp.float32), ((0, 0), (0, 0), (H, H)), mode='wrap')

    te = jnp.stack([time, epsilons], axis=-1).astype(jnp.float32)      # [B, 2]

    def film_affine(p):
        # FiLM linear path on [B, 2] (L-fold redundancy removed) + BN affine fold:
        #   ((h-mu)*inv_std*gamma + beta)*scale + bias
        #     == (h-mu)*inv_std*(gamma*scale) + (beta*scale + bias)
        t = jnp.dot(te, p['lin_w'].T, precision=hi) + p['lin_b']
        scale = jnp.dot(t, p['scale_w'].T, precision=hi) + p['scale_b']
        bias = jnp.dot(t, p['bias_w'].T, precision=hi) + p['bias_b']
        return p['bn_gamma'][None, :] * scale, p['bn_beta'][None, :] * scale + bias

    eff = [film_affine(params[f]) for f in ('film1', 'film2', 'film3')]
    fs = jnp.stack([e[0] for e in eff], 0)[:, :, :, None].astype(jnp.float32)
    fb = jnp.stack([e[1] for e in eff], 0)[:, :, :, None].astype(jnp.float32)

    def im2col_w(w):   # torch [C_out, C_in, K] -> [C_out, K*C_in], m = k*C_in + i
        return jnp.transpose(w, (0, 2, 1)).reshape(w.shape[0], -1).astype(jnp.float32)

    w1 = im2col_w(params['conv1_w'])                                   # [C, K1*C]
    w2 = im2col_w(params['conv2_w'])                                   # [C, K2*C]
    cb = jnp.stack([params['conv1_b'], params['conv2_b']],
                   axis=0)[:, :, None].astype(jnp.float32)             # [2, C, 1]

    flops = 2 * B * C * C * ((L + 2 * P2) * K1 + L * K2) + 12 * B * C * L
    cost = pl.CostEstimate(
        flops=int(flops),
        transcendentals=int(B * C * (2 * L + 2 * P2)),    # two tanh passes
        bytes_accessed=int(4 * (xp.size + B * C * L + w1.size + w2.size
                                + cb.size + fs.size + fb.size)))

    kernel = functools.partial(residual_block_kernel, B, L, C, K1, K2)
    out = pl.pallas_call(
        kernel,
        out_shape=jax.ShapeDtypeStruct((B, C, L), jnp.float32),
        in_specs=[pl.BlockSpec(memory_space=pltpu.MemorySpace.VMEM)] * 6,
        out_specs=pl.BlockSpec(memory_space=pltpu.MemorySpace.VMEM),
        # Explicit scoped-VMEM limit (safe on all generations: well below 64 MiB
        # v7x physical; raise toward 128 MiB on v5e/v6e for larger fused blocks).
        compiler_params=pltpu.CompilerParams(vmem_limit_bytes=32 * 1024 * 1024),
        cost_estimate=cost,
    )(xp, w1, w2, cb, fs, fb)
    return out   # already NCL; no wrapper-side transpose


def reference_forward(x, time, epsilons, params):
    """Pure-JAX reference mirroring the PyTorch module (NCL layout, unfused)."""
    te = jnp.stack([time, epsilons], axis=-1)
    hi = jax.lax.Precision.HIGHEST

    def circ_conv(h, w, b):
        K = w.shape[-1]
        P = K // 2
        hp = jnp.pad(h, ((0, 0), (0, 0), (P, P)), mode='wrap')
        y = jax.lax.conv_general_dilated(
            hp, w, window_strides=(1,), padding='VALID',
            dimension_numbers=('NCH', 'OIH', 'NCH'), precision=hi)
        return y + b[None, :, None]

    def film(h, p):
        mean = jnp.mean(h, axis=(0, 2), keepdims=True)
        var = jnp.mean((h - mean) ** 2, axis=(0, 2), keepdims=True)
        hn = (h - mean) * jax.lax.rsqrt(var + BN_EPS)
        hn = hn * p['bn_gamma'][None, :, None] + p['bn_beta'][None, :, None]
        t = jnp.dot(te, p['lin_w'].T, precision=hi) + p['lin_b']
        scale = jnp.dot(t, p['scale_w'].T, precision=hi) + p['scale_b']
        bias = jnp.dot(t, p['bias_w'].T, precision=hi) + p['bias_b']
        return hn * scale[:, :, None] + bias[:, :, None]

    h = circ_conv(x, params['conv1_w'], params['conv1_b'])
    h = jnp.tanh(h)
    h = film(h, params['film1'])
    h = circ_conv(h, params['conv2_w'], params['conv2_b'])
    h = jnp.tanh(h)
    h = film(h, params['film2'])
    return film(x, params['film3']) + h


def init_params(key, C, lift=32, k1=5, k2=11):
    ks = jax.random.split(key, 8)

    def u(k, shape, fan_in):
        bound = 1.0 / np.sqrt(fan_in)
        return jax.random.uniform(k, shape, jnp.float32, -bound, bound)

    params = {
        'conv1_w': u(ks[0], (C, C, k1), C * k1),
        'conv1_b': u(ks[1], (C,), C * k1),
        'conv2_w': u(ks[2], (C, C, k2), C * k2),
        'conv2_b': u(ks[3], (C,), C * k2),
    }
    # NOTE: torch's FILM.__init__ zeroes inp2scale/inp2bias weights (scale==1,
    # bias==0 at construction).  The test uses small random values instead so the
    # FiLM path (and the BN-affine folding) is actually exercised; kernel
    # semantics are identical for any parameter values.
    for i, f in enumerate(('film1', 'film2', 'film3')):
        kk = jax.random.split(ks[4 + i], 6)
        params[f] = {
            'bn_gamma': 1.0 + 0.1 * jax.random.normal(kk[0], (C,), jnp.float32),
            'bn_beta': 0.1 * jax.random.normal(kk[1], (C,), jnp.float32),
            'lin_w': u(kk[2], (lift, 2), 2),
            'lin_b': u(kk[3], (lift,), 2),
            'scale_w': u(kk[4], (C, lift), lift),
            'scale_b': jnp.ones((C,), jnp.float32),
            'bias_w': u(kk[5], (C, lift), lift),
            'bias_b': jnp.zeros((C,), jnp.float32),
        }
    return params


if __name__ == "__main__":
    key = jax.random.PRNGKey(0)
    kx, kt, ke, kp = jax.random.split(key, 4)
    B, C, L = 2, 4, 16
    x = jax.random.normal(kx, (B, C, L), jnp.float32)
    time = jax.random.normal(kt, (B,), jnp.float32)
    epsilons = jax.random.normal(ke, (B,), jnp.float32)
    params = init_params(kp, C)

    out = jax.block_until_ready(residual_block_forward(x, time, epsilons, params))
    ref = reference_forward(x, time, epsilons, params)

    assert out.shape == (B, C, L)
    # f32 end-to-end; small margin for the im2col association and the
    # (gamma/beta -> scale/bias) affine reassociation in the kernel path.
    np.testing.assert_allclose(np.asarray(out), np.asarray(ref), atol=2e-4, rtol=2e-4)
    print("KERNEL_OK")
</pallas_src>

<mosaic_0001>
module attributes {stable_mosaic.version = 11 : i64} {
  func.func @residual_block_kernel(%arg0: memref<2x4x30xf32, #tpu.memory_space<vmem>>, %arg1: memref<4x20xf32, #tpu.memory_space<vmem>>, %arg2: memref<4x44xf32, #tpu.memory_space<vmem>>, %arg3: memref<2x4x1xf32, #tpu.memory_space<vmem>>, %arg4: memref<3x2x4x1xf32, #tpu.memory_space<vmem>>, %arg5: memref<3x2x4x1xf32, #tpu.memory_space<vmem>>, %arg6: memref<2x4x16xf32, #tpu.memory_space<vmem>>) attributes {dimension_semantics = [], scalar_prefetch = 0 : i64, scratch_operands = 0 : i64, tpu.core_type = #tpu.core_type<tc>} {
    %c0 = arith.constant 0 : index
    %c0_0 = arith.constant 0 : index
    %c0_1 = arith.constant 0 : index
    %0 = vector.load %arg0[%c0, %c0_0, %c0_1] : memref<2x4x30xf32, #tpu.memory_space<vmem>>, vector<2x4x30xf32>
    %c0_2 = arith.constant 0 : index
    %c0_3 = arith.constant 0 : index
    %c0_4 = arith.constant 0 : index
    %1 = vector.load %arg3[%c0_2, %c0_3, %c0_4] : memref<2x4x1xf32, #tpu.memory_space<vmem>>, vector<1x4x1xf32>
    %2 = vector.shape_cast %1 : vector<1x4x1xf32> to vector<4x1xf32>
    %3 = vector.extract_strided_slice %0 {offsets = [0, 0, 0], sizes = [2, 4, 26], strides = [1, 1, 1]} : vector<2x4x30xf32> to vector<2x4x26xf32>
    %4 = vector.extract_strided_slice %0 {offsets = [0, 0, 1], sizes = [2, 4, 26], strides = [1, 1, 1]} : vector<2x4x30xf32> to vector<2x4x26xf32>
    %5 = vector.extract_strided_slice %0 {offsets = [0, 0, 2], sizes = [2, 4, 26], strides = [1, 1, 1]} : vector<2x4x30xf32> to vector<2x4x26xf32>
    %6 = vector.extract_strided_slice %0 {offsets = [0, 0, 3], sizes = [2, 4, 26], strides = [1, 1, 1]} : vector<2x4x30xf32> to vector<2x4x26xf32>
    %7 = vector.extract_strided_slice %0 {offsets = [0, 0, 4], sizes = [2, 4, 26], strides = [1, 1, 1]} : vector<2x4x30xf32> to vector<2x4x26xf32>
    %8 = tpu.concatenate %3, %4, %5, %6, %7 in 1 : vector<2x4x26xf32>, vector<2x4x26xf32>, vector<2x4x26xf32>, vector<2x4x26xf32>, vector<2x4x26xf32> -> vector<2x20x26xf32>
    %c0_5 = arith.constant 0 : index
    %c0_6 = arith.constant 0 : index
    %9 = vector.load %arg1[%c0_5, %c0_6] : memref<4x20xf32, #tpu.memory_space<vmem>>, vector<4x20xf32>
    %10 = vector.shape_cast %9 : vector<4x20xf32> to vector<1x4x20xf32>
    %11 = vector.shape_cast %10 : vector<1x4x20xf32> to vector<1x4x20xf32>
    %12 = vector.broadcast %11 : vector<1x4x20xf32> to vector<2x4x20xf32>
    "tpu.trace_start"() <{level = 10 : i32, message = "bom,bml->bol"}> : () -> ()
    %cst = arith.constant dense<0.000000e+00> : vector<2x4x26xf32>
    %13 = tpu.matmul %12, %8, %cst {dimension_numbers = #tpu.dot_dimension_numbers<[2], [1], [1], [2], [0, 0, 0, 1, 1, 2], [0], [0]>} : vector<2x4x20xf32>, vector<2x20x26xf32>, vector<2x4x26xf32> -> vector<2x4x26xf32>
    "tpu.trace_stop"() : () -> ()
    %14 = vector.shape_cast %2 : vector<4x1xf32> to vector<1x4x1xf32>
    %15 = vector.broadcast %14 : vector<1x4x1xf32> to vector<2x4x26xf32>
    %16 = arith.addf %13, %15 : vector<2x4x26xf32>
    %17 = math.tanh %16 : vector<2x4x26xf32>
    %18 = vector.extract_strided_slice %17 {offsets = [0, 0, 5], sizes = [2, 4, 16], strides = [1, 1, 1]} : vector<2x4x26xf32> to vector<2x4x16xf32>
    %cst_7 = arith.constant dense<0.000000e+00> : vector<2x4xf32>
    %19 = vector.multi_reduction <add>, %18, %cst_7 [2] : vector<2x4x16xf32> to vector<2x4xf32>
    %20 = vector.shape_cast %19 : vector<2x4xf32> to vector<2x4x1xf32>
    %cst_8 = arith.constant dense<0.000000e+00> : vector<4x1xf32>
    %21 = vector.multi_reduction <add>, %20, %cst_8 [0] : vector<2x4x1xf32> to vector<4x1xf32>
    %22 = vector.shape_cast %21 : vector<4x1xf32> to vector<1x4x1xf32>
    %cst_9 = arith.constant 3.125000e-02 : f32
    %23 = vector.broadcast %cst_9 : f32 to vector<1x4x1xf32>
    %24 = arith.mulf %22, %23 : vector<1x4x1xf32>
    %25 = vector.broadcast %24 : vector<1x4x1xf32> to vector<2x4x16xf32>
    %26 = arith.subf %18, %25 : vector<2x4x16xf32>
    %27 = arith.mulf %26, %26 : vector<2x4x16xf32>
    %cst_10 = arith.constant dense<0.000000e+00> : vector<2x4xf32>
    %28 = vector.multi_reduction <add>, %27, %cst_10 [2] : vector<2x4x16xf32> to vector<2x4xf32>
    %29 = vector.shape_cast %28 : vector<2x4xf32> to vector<2x4x1xf32>
    %cst_11 = arith.constant dense<0.000000e+00> : vector<4x1xf32>
    %30 = vector.multi_reduction <add>, %29, %cst_11 [0] : vector<2x4x1xf32> to vector<4x1xf32>
    %31 = vector.shape_cast %30 : vector<4x1xf32> to vector<1x4x1xf32>
    %cst_12 = arith.constant 3.125000e-02 : f32
    %32 = vector.broadcast %cst_12 : f32 to vector<1x4x1xf32>
    %33 = arith.mulf %31, %32 : vector<1x4x1xf32>
    %cst_13 = arith.constant 9.99999974E-6 : f32
    %34 = vector.broadcast %cst_13 : f32 to vector<1x4x1xf32>
    %35 = arith.addf %33, %34 : vector<1x4x1xf32>
    %36 = math.rsqrt %35 : vector<1x4x1xf32>
    %37 = vector.broadcast %24 : vector<1x4x1xf32> to vector<2x4x26xf32>
    %38 = arith.subf %17, %37 : vector<2x4x26xf32>
    %39 = vector.broadcast %36 : vector<1x4x1xf32> to vector<2x4x26xf32>
    %40 = arith.mulf %38, %39 : vector<2x4x26xf32>
    %c0_14 = arith.constant 0 : index
    %c0_15 = arith.constant 0 : index
    %c0_16 = arith.constant 0 : index
    %c0_17 = arith.constant 0 : index
    %41 = vector.load %arg4[%c0_14, %c0_15, %c0_16, %c0_17] : memref<3x2x4x1xf32, #tpu.memory_space<vmem>>, vector<1x2x4x1xf32>
    %42 = vector.shape_cast %41 : vector<1x2x4x1xf32> to vector<2x4x1xf32>
    %43 = vector.broadcast %42 : vector<2x4x1xf32> to vector<2x4x26xf32>
    %44 = arith.mulf %40, %43 : vector<2x4x26xf32>
    %c0_18 = arith.constant 0 : index
    %c0_19 = arith.constant 0 : index
    %c0_20 = arith.constant 0 : index
    %c0_21 = arith.constant 0 : index
    %45 = vector.load %arg5[%c0_18, %c0_19, %c0_20, %c0_21] : memref<3x2x4x1xf32, #tpu.memory_space<vmem>>, vector<1x2x4x1xf32>
    %46 = vector.shape_cast %45 : vector<1x2x4x1xf32> to vector<2x4x1xf32>
    %47 = vector.broadcast %46 : vector<2x4x1xf32> to vector<2x4x26xf32>
    %48 = arith.addf %44, %47 : vector<2x4x26xf32>
    %c1 = arith.constant 1 : index
    %c0_22 = arith.constant 0 : index
    %c0_23 = arith.constant 0 : index
    %49 = vector.load %arg3[%c1, %c0_22, %c0_23] : memref<2x4x1xf32, #tpu.memory_space<vmem>>, vector<1x4x1xf32>
    %50 = vector.shape_cast %49 : vector<1x4x1xf32> to vector<4x1xf32>
    %51 = vector.extract_strided_slice %48 {offsets = [0, 0, 0], sizes = [2, 4, 16], strides = [1, 1, 1]} : vector<2x4x26xf32> to vector<2x4x16xf32>
    %52 = vector.extract_strided_slice %48 {offsets = [0, 0, 1], sizes = [2, 4, 16], strides = [1, 1, 1]} : vector<2x4x26xf32> to vector<2x4x16xf32>
    %53 = vector.extract_strided_slice %48 {offsets = [0, 0, 2], sizes = [2, 4, 16], strides = [1, 1, 1]} : vector<2x4x26xf32> to vector<2x4x16xf32>
    %54 = vector.extract_strided_slice %48 {offsets = [0, 0, 3], sizes = [2, 4, 16], strides = [1, 1, 1]} : vector<2x4x26xf32> to vector<2x4x16xf32>
    %55 = vector.extract_strided_slice %48 {offsets = [0, 0, 4], sizes = [2, 4, 16], strides = [1, 1, 1]} : vector<2x4x26xf32> to vector<2x4x16xf32>
    %56 = vector.extract_strided_slice %48 {offsets = [0, 0, 5], sizes = [2, 4, 16], strides = [1, 1, 1]} : vector<2x4x26xf32> to vector<2x4x16xf32>
    %57 = vector.extract_strided_slice %48 {offsets = [0, 0, 6], sizes = [2, 4, 16], strides = [1, 1, 1]} : vector<2x4x26xf32> to vector<2x4x16xf32>
    %58 = vector.extract_strided_slice %48 {offsets = [0, 0, 7], sizes = [2, 4, 16], strides = [1, 1, 1]} : vector<2x4x26xf32> to vector<2x4x16xf32>
    %59 = vector.extract_strided_slice %48 {offsets = [0, 0, 8], sizes = [2, 4, 16], strides = [1, 1, 1]} : vector<2x4x26xf32> to vector<2x4x16xf32>
    %60 = vector.extract_strided_slice %48 {offsets = [0, 0, 9], sizes = [2, 4, 16], strides = [1, 1, 1]} : vector<2x4x26xf32> to vector<2x4x16xf32>
    %61 = vector.extract_strided_slice %48 {offsets = [0, 0, 10], sizes = [2, 4, 16], strides = [1, 1, 1]} : vector<2x4x26xf32> to vector<2x4x16xf32>
    %62 = tpu.concatenate %51, %52, %53, %54, %55, %56, %57, %58, %59, %60, %61 in 1 : vector<2x4x16xf32>, vector<2x4x16xf32>, vector<2x4x16xf32>, vector<2x4x16xf32>, vector<2x4x16xf32>, vector<2x4x16xf32>, vector<2x4x16xf32>, vector<2x4x16xf32>, vector<2x4x16xf32>, vector<2x4x16xf32>, vector<2x4x16xf32> -> vector<2x44x16xf32>
    %c0_24 = arith.constant 0 : index
    %c0_25 = arith.constant 0 : index
    %63 = vector.load %arg2[%c0_24, %c0_25] : memref<4x44xf32, #tpu.memory_space<vmem>>, vector<4x44xf32>
    %64 = vector.shape_cast %63 : vector<4x44xf32> to vector<1x4x44xf32>
    %65 = vector.shape_cast %64 : vector<1x4x44xf32> to vector<1x4x44xf32>
    %66 = vector.broadcast %65 : vector<1x4x44xf32> to vector<2x4x44xf32>
    "tpu.trace_start"() <{level = 10 : i32, message = "bom,bml->bol"}> : () -> ()
    %cst_26 = arith.constant dense<0.000000e+00> : vector<2x4x16xf32>
    %67 = tpu.matmul %66, %62, %cst_26 {dimension_numbers = #tpu.dot_dimension_numbers<[2], [1], [1], [2], [0, 0, 0, 1, 1, 2], [0], [0]>} : vector<2x4x44xf32>, vector<2x44x16xf32>, vector<2x4x16xf32> -> vector<2x4x16xf32>
    "tpu.trace_stop"() : () -> ()
    %68 = vector.shape_cast %50 : vector<4x1xf32> to vector<1x4x1xf32>
    %69 = vector.broadcast %68 : vector<1x4x1xf32> to vector<2x4x16xf32>
    %70 = arith.addf %67, %69 : vector<2x4x16xf32>
    %71 = math.tanh %70 : vector<2x4x16xf32>
    %cst_27 = arith.constant dense<0.000000e+00> : vector<2x4xf32>
    %72 = vector.multi_reduction <add>, %71, %cst_27 [2] : vector<2x4x16xf32> to vector<2x4xf32>
    %73 = vector.shape_cast %72 : vector<2x4xf32> to vector<2x4x1xf32>
    %cst_28 = arith.constant dense<0.000000e+00> : vector<4x1xf32>
    %74 = vector.multi_reduction <add>, %73, %cst_28 [0] : vector<2x4x1xf32> to vector<4x1xf32>
    %75 = vector.shape_cast %74 : vector<4x1xf32> to vector<1x4x1xf32>
    %cst_29 = arith.constant 3.125000e-02 : f32
    %76 = vector.broadcast %cst_29 : f32 to vector<1x4x1xf32>
    %77 = arith.mulf %75, %76 : vector<1x4x1xf32>
    %78 = vector.broadcast %77 : vector<1x4x1xf32> to vector<2x4x16xf32>
    %79 = arith.subf %71, %78 : vector<2x4x16xf32>
    %80 = arith.mulf %79, %79 : vector<2x4x16xf32>
    %cst_30 = arith.constant dense<0.000000e+00> : vector<2x4xf32>
    %81 = vector.multi_reduction <add>, %80, %cst_30 [2] : vector<2x4x16xf32> to vector<2x4xf32>
    %82 = vector.shape_cast %81 : vector<2x4xf32> to vector<2x4x1xf32>
    %cst_31 = arith.constant dense<0.000000e+00> : vector<4x1xf32>
    %83 = vector.multi_reduction <add>, %82, %cst_31 [0] : vector<2x4x1xf32> to vector<4x1xf32>
    %84 = vector.shape_cast %83 : vector<4x1xf32> to vector<1x4x1xf32>
    %cst_32 = arith.constant 3.125000e-02 : f32
    %85 = vector.broadcast %cst_32 : f32 to vector<1x4x1xf32>
    %86 = arith.mulf %84, %85 : vector<1x4x1xf32>
    %cst_33 = arith.constant 9.99999974E-6 : f32
    %87 = vector.broadcast %cst_33 : f32 to vector<1x4x1xf32>
    %88 = arith.addf %86, %87 : vector<1x4x1xf32>
    %89 = math.rsqrt %88 : vector<1x4x1xf32>
    %90 = vector.broadcast %77 : vector<1x4x1xf32> to vector<2x4x16xf32>
    %91 = arith.subf %71, %90 : vector<2x4x16xf32>
    %92 = vector.broadcast %89 : vector<1x4x1xf32> to vector<2x4x16xf32>
    %93 = arith.mulf %91, %92 : vector<2x4x16xf32>
    %c1_34 = arith.constant 1 : index
    %c0_35 = arith.constant 0 : index
    %c0_36 = arith.constant 0 : index
    %c0_37 = arith.constant 0 : index
    %94 = vector.load %arg4[%c1_34, %c0_35, %c0_36, %c0_37] : memref<3x2x4x1xf32, #tpu.memory_space<vmem>>, vector<1x2x4x1xf32>
    %95 = vector.shape_cast %94 : vector<1x2x4x1xf32> to vector<2x4x1xf32>
    %96 = vector.broadcast %95 : vector<2x4x1xf32> to vector<2x4x16xf32>
    %97 = arith.mulf %93, %96 : vector<2x4x16xf32>
    %c1_38 = arith.constant 1 : index
    %c0_39 = arith.constant 0 : index
    %c0_40 = arith.constant 0 : index
    %c0_41 = arith.constant 0 : index
    %98 = vector.load %arg5[%c1_38, %c0_39, %c0_40, %c0_41] : memref<3x2x4x1xf32, #tpu.memory_space<vmem>>, vector<1x2x4x1xf32>
    %99 = vector.shape_cast %98 : vector<1x2x4x1xf32> to vector<2x4x1xf32>
    %100 = vector.broadcast %99 : vector<2x4x1xf32> to vector<2x4x16xf32>
    %101 = arith.addf %97, %100 : vector<2x4x16xf32>
    %102 = vector.extract_strided_slice %0 {offsets = [0, 0, 7], sizes = [2, 4, 16], strides = [1, 1, 1]} : vector<2x4x30xf32> to vector<2x4x16xf32>
    %cst_42 = arith.constant dense<0.000000e+00> : vector<2x4xf32>
    %103 = vector.multi_reduction <add>, %102, %cst_42 [2] : vector<2x4x16xf32> to vector<2x4xf32>
    %104 = vector.shape_cast %103 : vector<2x4xf32> to vector<2x4x1xf32>
    %cst_43 = arith.constant dense<0.000000e+00> : vector<4x1xf32>
    %105 = vector.multi_reduction <add>, %104, %cst_43 [0] : vector<2x4x1xf32> to vector<4x1xf32>
    %106 = vector.shape_cast %105 : vector<4x1xf32> to vector<1x4x1xf32>
    %cst_44 = arith.constant 3.125000e-02 : f32
    %107 = vector.broadcast %cst_44 : f32 to vector<1x4x1xf32>
    %108 = arith.mulf %106, %107 : vector<1x4x1xf32>
    %109 = vector.broadcast %108 : vector<1x4x1xf32> to vector<2x4x16xf32>
    %110 = arith.subf %102, %109 : vector<2x4x16xf32>
    %111 = arith.mulf %110, %110 : vector<2x4x16xf32>
    %cst_45 = arith.constant dense<0.000000e+00> : vector<2x4xf32>
    %112 = vector.multi_reduction <add>, %111, %cst_45 [2] : vector<2x4x16xf32> to vector<2x4xf32>
    %113 = vector.shape_cast %112 : vector<2x4xf32> to vector<2x4x1xf32>
    %cst_46 = arith.constant dense<0.000000e+00> : vector<4x1xf32>
    %114 = vector.multi_reduction <add>, %113, %cst_46 [0] : vector<2x4x1xf32> to vector<4x1xf32>
    %115 = vector.shape_cast %114 : vector<4x1xf32> to vector<1x4x1xf32>
    %cst_47 = arith.constant 3.125000e-02 : f32
    %116 = vector.broadcast %cst_47 : f32 to vector<1x4x1xf32>
    %117 = arith.mulf %115, %116 : vector<1x4x1xf32>
    %cst_48 = arith.constant 9.99999974E-6 : f32
    %118 = vector.broadcast %cst_48 : f32 to vector<1x4x1xf32>
    %119 = arith.addf %117, %118 : vector<1x4x1xf32>
    %120 = math.rsqrt %119 : vector<1x4x1xf32>
    %121 = vector.broadcast %108 : vector<1x4x1xf32> to vector<2x4x16xf32>
    %122 = arith.subf %102, %121 : vector<2x4x16xf32>
    %123 = vector.broadcast %120 : vector<1x4x1xf32> to vector<2x4x16xf32>
    %124 = arith.mulf %122, %123 : vector<2x4x16xf32>
    %c2 = arith.constant 2 : index
    %c0_49 = arith.constant 0 : index
    %c0_50 = arith.constant 0 : index
    %c0_51 = arith.constant 0 : index
    %125 = vector.load %arg4[%c2, %c0_49, %c0_50, %c0_51] : memref<3x2x4x1xf32, #tpu.memory_space<vmem>>, vector<1x2x4x1xf32>
    %126 = vector.shape_cast %125 : vector<1x2x4x1xf32> to vector<2x4x1xf32>
    %127 = vector.broadcast %126 : vector<2x4x1xf32> to vector<2x4x16xf32>
    %128 = arith.mulf %124, %127 : vector<2x4x16xf32>
    %c2_52 = arith.constant 2 : index
    %c0_53 = arith.constant 0 : index
    %c0_54 = arith.constant 0 : index
    %c0_55 = arith.constant 0 : index
    %129 = vector.load %arg5[%c2_52, %c0_53, %c0_54, %c0_55] : memref<3x2x4x1xf32, #tpu.memory_space<vmem>>, vector<1x2x4x1xf32>
    %130 = vector.shape_cast %129 : vector<1x2x4x1xf32> to vector<2x4x1xf32>
    %131 = vector.broadcast %130 : vector<2x4x1xf32> to vector<2x4x16xf32>
    %132 = arith.addf %128, %131 : vector<2x4x16xf32>
    %133 = arith.addf %132, %101 : vector<2x4x16xf32>
    %c0_56 = arith.constant 0 : index
    %c0_57 = arith.constant 0 : index
    %c0_58 = arith.constant 0 : index
    %134 = vector.load %arg6[%c0_56, %c0_57, %c0_58] : memref<2x4x16xf32, #tpu.memory_space<vmem>>, vector<2x4x16xf32>
    tpu.vector_store %arg6[%c0_56, %c0_57, %c0_58], %133 {strides = array<i32>} : memref<2x4x16xf32, #tpu.memory_space<vmem>>, vector<2x4x16xf32>,
    return
  }
}

</mosaic_0001>

<bundles_post_ra>
// kernel: tpu_custom_call.1
= control target key start
LH: loop header
LB: loop body
LE: loop exit
PB: predicated region body
PF: predicated region fallthrough
CT: control target
= control target key end

     0   :  { %v920_v4 = vmov 0.0|0.0   ;;  %s1142_s0 = inlined_call_operand.vmem [shape: f32[2,4,30], index: 0, kind: input, shape index: {}]   ;;  %s1143_s1 = inlined_call_operand.vmem [shape: f32[4,20], index: 1, kind: input, shape index: {}]   ;;  %s1144_s2 = inlined_call_operand.vmem [shape: f32[4,44], index: 2, kind: input, shape index: {}]   ;;  %s1145_s3 = inlined_call_operand.vmem [shape: f32[2,4,1], index: 3, kind: input, shape index: {}]   ;;  %s1146_s4 = inlined_call_operand.vmem [shape: f32[3,2,4,1], index: 4, kind: input, shape index: {}]   ;;  %s1147_s5 = inlined_call_operand.vmem [shape: f32[3,2,4,1], index: 5, kind: input, shape index: {}]   ;;  %s1148_s6 = inlined_call_operand.hbm [shape: f32[2,4,16], index: 6, kind: output, shape index: {}]  }
   0x1   :  { %v977_v0 = vld [vmem:[%s1142_s0] sm:$0xf]  ;;  %v982_v1 = vld [vmem:[%s1142_s0 + $0x4] sm:$0xf]  ;;  %770 = vmatprep.subr.bf16.mxu0 %v920_v4  ;;  %773 = vmatprep.subr.bf16.mxu1 %v920_v4 }
   0x2   :  { %v29_v2 = vrot.slane %v977_v0, 4  ;;  %v30_v3 = vrot.slane %v982_v1, 4 }
   0x3   :  { %11 = vsyncpa [#allocation3], 0  ;;  %s921_s25 = smov 127   ;;  %s922_s26 = smov 125   ;;  %v820_v6 = vpack.i.bf16 %v982_v1, %v977_v0  ;;  %vm923_vm0 = vmmov 0   ;;  %v924_v7 = vmov 0.0  }
   0x4   :  { %v815_v5 = vpack.i.bf16 %v30_v3, %v29_v2  ;;  %728 = vmatprep.mubr.msk.f32.mxu0 %vm923_vm0, %v924_v7  ;;  %737 = vmatprep.mubr.msk.f32.mxu1 %vm923_vm0, %v924_v7  ;;  %v925_v8 = vmov 0   ;;  %s926_s0 = smov 126   ;;  %s927_s27 = smov 124   ;;  %v26_v9 = vld [vmem:[%s1145_s3] sm:$0xf]  ;;  %vm53_vm1 = vcmask 1043456  }
   0x5   :  { %830 = vset.pattern.permute.xlu1 %v925_v8  ;;  %831 = vset.pattern.permute.xlu0 %v925_v8  ;;  %v58_v27 = vld [vmem:[%s1143_s1] sm:$0xf]  ;;  %vm64_vm2 = vcmask 162816   ;;  %s928_s1 = smov 123   ;;  %vm222_vm3 = vcmask 125952   ;;  %s929_s16 = smov 121  }
   0x6   :  { %816 = vrot.lane.b32.xlu0 %v815_v5, %s921_s25  ;;  %826 = vrot.lane.b32.xlu1 %v815_v5, %s922_s26  ;;  %v260_v51 = vld [vmem:[%s1146_s4 + $0x4] sm:$0xf]  ;;  %v273_v52 = vld [vmem:[%s1147_s5] sm:$0xf]  ;;  %s930_s17 = smov 119   ;;  %s931_s20 = smov 122  }
   0x7   :  { %v274_v57 = vld [vmem:[%s1147_s5 + $0x4] sm:$0xf]  ;;  %v259_v58 = vld [vmem:[%s1146_s4] sm:$0xf]  ;;  %s932_s21 = smov 120   ;;  %s933_s22 = smov 118  }
   0x8   :  { %vm934_vm4 = vmmov 1   ;;  %vm367_vm6 = vcmask 359424  }
   0x9   :  { %vm784_vm5 = vmpackc.low %vm53_vm1, %vm934_vm4 }
   0xa   :  { %821 = vrot.lane.b32.xlu0 %v820_v6, %s926_s0  ;;  %49 = vrot.lane.b32.xlu1 %v977_v0, %s927_s27 }
   0xe   :  { %51 = vrot.lane.b32.xlu0 %v982_v1, %s927_s27  ;;  %61 = vperm.xlu1 %830, %v26_v9  }
  0x78   :  { %v817_v10 = vpop.permute.xlu0 %816  ;;  %v827_v11 = vpop.permute.xlu1 %826 }
  0x79   :  { %v819_v12 = vunpack.i.h.bf16 %v817_v10  ;;  %v818_v13 = vunpack.i.l.bf16 %v817_v10  ;;  %v829_v14 = vunpack.i.h.bf16 %v827_v11  ;;  %v828_v15 = vunpack.i.l.bf16 %v827_v11 }
  0x7b   :  { %v54_v19 = vsel %vm53_vm1, %v977_v0, %v818_v13  ;;  %v55_v21 = vsel %vm53_vm1, %v982_v1, %v819_v12 }
  0x7c   :  { %v822_v16 = vpop.permute.xlu0 %821  ;;  %v50_v25 = vpop.permute.xlu1 %49 }
  0x7d   :  { %v824_v17 = vunpack.i.h.bf16 %v822_v16  ;;  %v823_v18 = vunpack.i.l.bf16 %v822_v16 }
  0x7f   :  { %v56_v20 = vsel %vm53_vm1, %v823_v18, %v828_v15  ;;  %v57_v22 = vsel %vm53_vm1, %v824_v17, %v829_v14 }
  0x80   :  { %v771_v23 = vpack.c.bf16 %v56_v20, %v54_v19  ;;  %v774_v24 = vpack.c.bf16 %v57_v22, %v55_v21  ;;  %v52_v26 = vpop.permute.xlu0 %51  ;;  %v687_v20 = vld [vmem:[%s1145_s3 + $0x4] sm:$0xf] }
  0x82   :  { %772 = vmatpush3.bf16.msra.mxu0 %v771_v23  ;;  %775 = vmatpush3.bf16.msra.mxu1 %v774_v24 }
  0x83   :  { %726 = vmatprep.subr.mxu0 %v924_v7  ;;  %735 = vmatprep.subr.mxu1 %v924_v7 }
  0x86   :  { %727 = vmatpush3.msk.msra.mxu0 %vm53_vm1, %v50_v25  ;;  %736 = vmatpush3.msk.msra.mxu1 %vm53_vm1, %v52_v26 }
  0x87   :  { %729 = vmatmul.mubr.msk.f32.vlgmr.msra.gmra.mrb[0].mxu0 %vm64_vm2, %v58_v27  ;;  %738 = vmatmul.mubr.msk.f32.vlgmr.msra.gmra.mrb[0].mxu1 %vm64_vm2, %v58_v27 }
  0x88   :  { %776 = vmatprep.subr.bf16.mxu0 %v920_v4  ;;  %786 = vmatprep.subr.bf16.mxu1 %v920_v4 }
  0x89   :  { %752 = vmatprep.mubr.msk.f32.mxu0 %vm923_vm0, %v924_v7  ;;  %767 = vmatprep.mubr.msk.f32.mxu1 %vm923_vm0, %v924_v7 }
  0x8d   :  { %v62_v28 = vpop.permute.xlu1 %61 }
 0x15a   :  { %v136_v29 = vpop.f32.mrb[0].mxu0  ;;  %v208_v30 = vpop.f32.mrb[0].mxu1 }
 0x15b   :  { %v137_v31 = vadd.f32 %v136_v29, %v62_v28  ;;  %v209_v32 = vadd.f32 %v208_v30, %v62_v28  ;;  %v730_v33 = vpop.f32.mrb[1].mxu0  ;;  %v739_v34 = vpop.f32.mrb[1].mxu1 }
 0x15d   :  { %882 = vtanh.f32 %v137_v31 }
 0x15e   :  { %884 = vtanh.f32 %v209_v32 }
 0x167   :  { %v883_v35 = vpop.eup %882 }
 0x168   :  { %v885_v36 = vpop.eup %884  ;;  %216 = vrot.lane.b32.xlu0 %v883_v35, %s928_s1 }
 0x169   :  { %218 = vrot.lane.b32.xlu1 %v885_v36, %s928_s1 }
 0x1da   :  { %v217_v37 = vpop.permute.xlu0 %216 }
 0x1db   :  { %v219_v38 = vpop.permute.xlu1 %218  ;;  %v223_v39 = vsel %vm222_vm3, %v217_v37, 0.0 }
 0x1dc   :  { %v226_v40 = vsel %vm222_vm3, %v219_v38, 0.0  ;;  %224 = vadd.xlane.f32.xlu0 %v223_v39 }
 0x1dd   :  { %227 = vadd.xlane.f32.xlu1 %v226_v40 }
 0x269   :  { %v225_v41 = vpop.xlane.xlu0 %224 }
 0x26a   :  { %v228_v42 = vpop.xlane.xlu1 %227  ;;  %v229_v43 = vsel %vm53_vm1, %v225_v41, 0.0 }
 0x26b   :  { %v230_v44 = vsel %vm53_vm1, %v228_v42, 0.0 }
 0x26c   :  { %v231_v45 = vadd.f32 %v230_v44, %v229_v43 }
 0x26e   :  { %v232_v46 = vmul.f32 0.03125, %v231_v45 }
 0x270   :  { %v233_v47 = vsub.f32 %v883_v35, %v232_v46  ;;  %v234_v48 = vsub.f32 %v885_v36, %v232_v46 }
 0x272   :  { %v236_v49 = vmul.f32 %v234_v48, %v234_v48  ;;  %v235_v50 = vmul.f32 %v233_v47, %v233_v47 }
 0x274   :  { %241 = vrot.lane.b32.xlu1 %v236_v49, %s928_s1  ;;  %239 = vrot.lane.b32.xlu0 %v235_v50, %s928_s1 }
 0x278   :  { %268 = vperm.xlu1 %830, %v260_v51  }
 0x27c   :  { %277 = vperm.xlu1 %830, %v273_v52  }
 0x2e6   :  { %v242_v53 = vpop.permute.xlu1 %241  ;;  %v240_v54 = vpop.permute.xlu0 %239 }
 0x2e7   :  { %v248_v55 = vsel %vm222_vm3, %v242_v53, 0.0  ;;  %v245_v56 = vsel %vm222_vm3, %v240_v54, 0.0 }
 0x2e8   :  { %249 = vadd.xlane.f32.xlu1 %v248_v55  ;;  %246 = vadd.xlane.f32.xlu0 %v245_v56 }
 0x2f7   :  { %v269_v59 = vpop.permute.xlu1 %268 }
 0x2f9   :  { %282 = vperm.xlu1 %830, %v274_v57  }
 0x2fb   :  { %v278_v60 = vpop.permute.xlu1 %277 }
 0x2fe   :  { %263 = vperm.xlu0 %831, %v259_v58  }
 0x375   :  { %v250_v61 = vpop.xlane.xlu1 %249  ;;  %v247_v62 = vpop.xlane.xlu0 %246 }
 0x376   :  { %v252_v63 = vsel %vm53_vm1, %v250_v61, 0.0  ;;  %v251_v2 = vsel %vm53_vm1, %v247_v62, 0.0 }
 0x377   :  { %v253_v3 = vadd.f32 %v252_v63, %v251_v2 }
 0x379   :  { %v254_v5 = vmul.f32 0.03125, %v253_v3  ;;  %v283_v13 = vpop.permute.xlu1 %282 }
 0x37b   :  { %v255_v6 = vadd.f32 1e-05, %v254_v5 }
 0x37d   :  { %886 = vrsqrt.f32 %v255_v6  ;;  %v264_v8 = vpop.permute.xlu0 %263 }
 0x387   :  { %v887_v7 = vpop.eup %886 }
 0x388   :  { %v258_v9 = vmul.f32 %v887_v7, %v234_v48  ;;  %v257_v10 = vmul.f32 %v887_v7, %v233_v47 }
 0x38a   :  { %v272_v11 = vmul.f32 %v269_v59, %v258_v9  ;;  %v271_v12 = vmul.f32 %v264_v8, %v257_v10 }
 0x38c   :  { %v286_v14 = vadd.f32 %v283_v13, %v272_v11  ;;  %v285_v15 = vadd.f32 %v278_v60, %v271_v12 }
 0x38e   :  { %v832_v16 = vpack.i.bf16 %v286_v14, %v285_v15  ;;  %v291_v17 = vrot.slane %v285_v15, 4  ;;  %v292_v18 = vrot.slane %v286_v14, 4 }
 0x390   :  { %833 = vrot.lane.b32.xlu1 %v832_v16, %s926_s0  ;;  %v862_v19 = vpack.i.bf16 %v292_v18, %v291_v17 }
 0x392   :  { %863 = vrot.lane.b32.xlu0 %v862_v19, %s928_s1 }
 0x394   :  { %838 = vrot.lane.b32.xlu1 %v832_v16, %s927_s27 }
 0x396   :  { %868 = vrot.lane.b32.xlu0 %v862_v19, %s929_s16 }
 0x398   :  { %843 = vrot.lane.b32.xlu1 %v862_v19, %s921_s25 }
 0x39a   :  { %873 = vrot.lane.b32.xlu0 %v862_v19, %s930_s17 }
 0x39c   :  { %848 = vrot.lane.b32.xlu1 %v862_v19, %s922_s26 }
 0x39e   :  { %364 = vperm.xlu0 %831, %v687_v20  }
 0x3a0   :  { %853 = vrot.lane.b32.xlu1 %v832_v16, %s931_s20 }
 0x3a2   :  { %577 = vrot.lane.b32.xlu0 %v982_v1, %s929_s16 }
 0x3a4   :  { %858 = vrot.lane.b32.xlu1 %v832_v16, %s932_s21 }
 0x3a8   :  { %878 = vrot.lane.b32.xlu1 %v832_v16, %s933_s22 }
 0x3ac   :  { %575 = vrot.lane.b32.xlu1 %v977_v0, %s929_s16 }
 0x402   :  { %v834_v21 = vpop.permute.xlu1 %833 }
 0x403   :  { %v836_v28 = vunpack.i.h.bf16 %v834_v21  ;;  %v835_v29 = vunpack.i.l.bf16 %v834_v21 }
 0x404   :  { %v864_v23 = vpop.permute.xlu0 %863 }
 0x405   :  { %v866_v39 = vunpack.i.h.bf16 %v864_v23  ;;  %v865_v40 = vunpack.i.l.bf16 %v864_v23 }
 0x406   :  { %v839_v22 = vpop.permute.xlu1 %838 }
 0x407   :  { %v841_v32 = vunpack.i.h.bf16 %v839_v22  ;;  %v840_v33 = vunpack.i.l.bf16 %v839_v22 }
 0x408   :  { %v869_v34 = vpop.permute.xlu0 %868 }
 0x409   :  { %v871_v44 = vunpack.i.h.bf16 %v869_v34  ;;  %v870_v45 = vunpack.i.l.bf16 %v869_v34  ;;  %v355_v48 = vsel %vm53_vm1, %v840_v33, %v865_v40  ;;  %v356_v49 = vsel %vm53_vm1, %v841_v32, %v866_v39  ;;  %v693_v33 = vld [vmem:[%s1146_s4 + $0xc] sm:$0xf] }
 0x40a   :  { %v844_v24 = vpop.permute.xlu1 %843 }
 0x40b   :  { %v846_v25 = vunpack.i.h.bf16 %v844_v24  ;;  %v845_v26 = vunpack.i.l.bf16 %v844_v24 }
 0x40c   :  { %v874_v55 = vpop.permute.xlu0 %873 }
 0x40d   :  { %v352_v35 = vsel %vm53_vm1, %v286_v14, %v846_v25  ;;  %v351_v36 = vsel %vm53_vm1, %v285_v15, %v845_v26  ;;  %v876_v58 = vunpack.i.h.bf16 %v874_v55  ;;  %v875_v59 = vunpack.i.l.bf16 %v874_v55 }
 0x40e   :  { %v849_v27 = vpop.permute.xlu1 %848 }
 0x40f   :  { %v851_v30 = vunpack.i.h.bf16 %v849_v27  ;;  %v850_v31 = vunpack.i.l.bf16 %v849_v27 }
 0x411   :  { %v354_v37 = vsel %vm53_vm1, %v836_v28, %v851_v30  ;;  %v353_v38 = vsel %vm53_vm1, %v835_v29, %v850_v31 }
 0x412   :  { %v777_v41 = vpack.c.bf16 %v353_v38, %v351_v36  ;;  %v787_v42 = vpack.c.bf16 %v354_v37, %v352_v35  ;;  %v854_v43 = vpop.permute.xlu1 %853 }
 0x413   :  { %v856_v46 = vunpack.i.h.bf16 %v854_v43  ;;  %v855_v47 = vunpack.i.l.bf16 %v854_v43  ;;  %v694_v43 = vld [vmem:[%s1147_s5 + $0x8] sm:$0xf] }
 0x414   :  { %778 = vmatpush3.bf16.msra.mxu0 %v777_v41  ;;  %788 = vmatpush3.bf16.msra.mxu1 %v787_v42 }
 0x415   :  { %v358_v50 = vsel %vm53_vm1, %v856_v46, %v871_v44  ;;  %v357_v51 = vsel %vm53_vm1, %v855_v47, %v870_v45  ;;  %779 = vmatprep.subr.bf16.mxu0 %v920_v4  ;;  %789 = vmatprep.subr.bf16.mxu1 %v920_v4  ;;  %v695_v44 = vld [vmem:[%s1147_s5 + $0xc] sm:$0xf] }
 0x416   :  { %v790_v52 = vpack.c.bf16 %v358_v50, %v356_v49  ;;  %v780_v53 = vpack.c.bf16 %v357_v51, %v355_v48  ;;  %v859_v54 = vpop.permute.xlu1 %858  ;;  %v697_v49 = vld [vmem:[%s1146_s4 + $0x14] sm:$0xf]  ;;  %v698_v50 = vld [vmem:[%s1147_s5 + $0x10] sm:$0xf] }
 0x417   :  { %v861_v56 = vunpack.i.h.bf16 %v859_v54  ;;  %v860_v57 = vunpack.i.l.bf16 %v859_v54  ;;  %v696_v51 = vld [vmem:[%s1146_s4 + $0x10] sm:$0xf] }
 0x418   :  { %781 = vmatpush3.bf16.msra.mxu0 %v780_v53  ;;  %791 = vmatpush3.bf16.msra.mxu1 %v790_v52  ;;  %v699_v52 = vld [vmem:[%s1147_s5 + $0x14] sm:$0xf]  ;;  %s936_s5 = smov [#allocation2]  }
 0x419   :  { %782 = vmatprep.subr.bf16.mxu0 %v920_v4  ;;  %792 = vmatprep.subr.bf16.mxu1 %v920_v4  ;;  %v359_v63 = vsel %vm53_vm1, %v860_v57, %v875_v59  ;;  %v360_v2 = vsel %vm53_vm1, %v861_v56, %v876_v58  ;;  %v361_v4 = vld [vmem:[%s1144_s2] sm:$0xf]  ;;  %s672_s13 = sshll.u32 %s936_s5, 4  ;;  %s673_s13 = int_to_ptr.vmem [resolvable:$true] %s672_s13 }
 0x41a   :  { %v879_v60 = vpop.permute.xlu1 %878  ;;  %s896_s14 = scalar_lea.vmem %s673_s13, 128  ;;  %p901_p1 = scmp.lt.s32.totalorder %s673_s13, %s673_s13 }
 0x41b   :  { %v881_v61 = vunpack.i.h.bf16 %v879_v60  ;;  %v880_v62 = vunpack.i.l.bf16 %v879_v60  ;;  %p897_p0 = scmp.ne.s32.totalorder %s673_s13, %s896_s14  ;;  %p902_p2 = scmp.lt.s32.totalorder %s896_s14, %s896_s14 }
 0x41d   :  { %v783_v3 = vpack.c.bf16 %v880_v62, %v359_v63  ;;  %v793_v5 = vpack.c.bf16 %v881_v61, %v360_v2  ;;  %v365_v6 = vpop.permute.xlu0 %364  ;;  %p903_p3 = por %p902_p2, %p901_p1 }
 0x41e   :  { %v576_v17 = vpop.permute.xlu1 %575 }
 0x41f   :  { %785 = vmatpush3.bf16.msk.msra.mxu0 %vm784_vm5, %v783_v3  ;;  %795 = vmatpush3.bf16.msk.msra.mxu1 %vm784_vm5, %v793_v5  ;;  %v581_v20 = vsel %vm222_vm3, %v576_v17, 0.0  ;;  %p904_p4 = pnand %p903_p3, %p897_p0 }
 0x421   :  { %v578_v14 = vpop.permute.xlu0 %577 }
 0x422   :  { %753 = vmatmul.mubr.msk.f32.vlgmr.msra.gmra.mrb[2].mxu0 %vm367_vm6, %v361_v4  ;;  %768 = vmatmul.mubr.msk.f32.vlgmr.msra.gmra.mrb[2].mxu1 %vm367_vm6, %v361_v4  ;;  %v584_v19 = vsel %vm222_vm3, %v578_v14, 0.0 }
 0x4f5   :  { %v439_v7 = vpop.f32.mrb[2].mxu0  ;;  %v511_v8 = vpop.f32.mrb[2].mxu1 }
 0x4f6   :  { %v440_v9 = vadd.f32 %v439_v7, %v365_v6  ;;  %v512_v10 = vadd.f32 %v511_v8, %v365_v6  ;;  %v754_v11 = vpop.f32.mrb[3].mxu0  ;;  %v769_v12 = vpop.f32.mrb[3].mxu1 }
 0x4f8   :  { %888 = vtanh.f32 %v440_v9 }
 0x4f9   :  { %890 = vtanh.f32 %v512_v10 }
 0x502   :  { %v889_v13 = vpop.eup %888 }
 0x503   :  { %v891_v15 = vpop.eup %890  ;;  %v517_v16 = vsel %vm222_vm3, %v889_v13, 0.0 }
 0x504   :  { %v520_v18 = vsel %vm222_vm3, %v891_v15, 0.0  ;;  %518 = vadd.xlane.f32.xlu1 %v517_v16 }
 0x505   :  { %521 = vadd.xlane.f32.xlu0 %v520_v18 }
 0x508   :  { %585 = vadd.xlane.f32.xlu1 %v584_v19 }
 0x509   :  { %582 = vadd.xlane.f32.xlu0 %v581_v20 }
 0x591   :  { %v519_v21 = vpop.xlane.xlu1 %518 }
 0x592   :  { %v522_v22 = vpop.xlane.xlu0 %521  ;;  %v523_v34 = vsel %vm53_vm1, %v519_v21, 0.0 }
 0x595   :  { %v586_v23 = vpop.xlane.xlu1 %585 }
 0x596   :  { %v583_v24 = vpop.xlane.xlu0 %582  ;;  %v588_v25 = vsel %vm53_vm1, %v586_v23, 0.0 }
 0x597   :  { %v587_v26 = vsel %vm53_vm1, %v583_v24, 0.0 }
 0x598   :  { %v589_v27 = vadd.f32 %v588_v25, %v587_v26 }
 0x59a   :  { %v590_v28 = vmul.f32 0.03125, %v589_v27 }
 0x59c   :  { %v1079_v29 = vsub.f32 %v977_v0, %v590_v28  ;;  %v1082_v30 = vsub.f32 %v982_v1, %v590_v28  ;;  %v692_v0 = vld [vmem:[%s1146_s4 + $0x8] sm:$0xf]  ;;  %v524_v1 = vsel %vm53_vm1, %v522_v22, 0.0  ;;  %s935_s4 = smov 7  }
 0x59d   :  { %v525_v35 = vadd.f32 %v524_v1, %v523_v34 }
 0x59e   :  { %v594_v31 = vmul.f32 %v1082_v30, %v1082_v30  ;;  %v593_v32 = vmul.f32 %v1079_v29, %v1079_v29 }
 0x59f   :  { %v526_v36 = vmul.f32 0.03125, %v525_v35 }
 0x5a0   :  { %599 = vrot.lane.b32.xlu1 %v594_v31, %s929_s16  ;;  %597 = vrot.lane.b32.xlu0 %v593_v32, %s929_s16 }
 0x5a1   :  { %v528_v37 = vsub.f32 %v891_v15, %v526_v36  ;;  %v527_v39 = vsub.f32 %v889_v13, %v526_v36 }
 0x5a3   :  { %v530_v38 = vmul.f32 %v528_v37, %v528_v37  ;;  %v529_v41 = vmul.f32 %v527_v39, %v527_v39 }
 0x5a4   :  { %555 = vperm.xlu1 %830, %v693_v33   ;;  %550 = vperm.xlu0 %831, %v692_v0  }
 0x5a5   :  { %v534_v40 = vsel %vm222_vm3, %v530_v38, 0.0  ;;  %v531_v42 = vsel %vm222_vm3, %v529_v41, 0.0 }
 0x5c3   :  { %535 = vadd.xlane.f32.xlu0 %v534_v40 }
 0x5c8   :  { %532 = vadd.xlane.f32.xlu1 %v531_v42 }
 0x5d9   :  { %565 = vperm.xlu1 %830, %v694_v43   ;;  %570 = vperm.xlu0 %831, %v695_v44  }
 0x612   :  { %v600_v45 = vpop.permute.xlu1 %599  ;;  %v598_v46 = vpop.permute.xlu0 %597 }
 0x613   :  { %v606_v47 = vsel %vm222_vm3, %v600_v45, 0.0  ;;  %v603_v48 = vsel %vm222_vm3, %v598_v46, 0.0 }
 0x614   :  { %607 = vadd.xlane.f32.xlu0 %v606_v47  ;;  %604 = vadd.xlane.f32.xlu1 %v603_v48 }
 0x623   :  { %v551_v53 = vpop.permute.xlu0 %550  ;;  %v556_v54 = vpop.permute.xlu1 %555 }
 0x625   :  { %627 = vperm.xlu1 %830, %v697_v49  }
 0x629   :  { %637 = vperm.xlu1 %830, %v698_v50  }
 0x62a   :  { %622 = vperm.xlu0 %831, %v696_v51  }
 0x62e   :  { %642 = vperm.xlu0 %831, %v699_v52  }
 0x650   :  { %v536_v55 = vpop.xlane.xlu0 %535 }
 0x651   :  { %v538_v57 = vsel %vm53_vm1, %v536_v55, 0.0 }
 0x655   :  { %v533_v56 = vpop.xlane.xlu1 %532 }
 0x656   :  { %v537_v58 = vsel %vm53_vm1, %v533_v56, 0.0 }
 0x657   :  { %v539_v59 = vadd.f32 %v538_v57, %v537_v58 }
 0x658   :  { %v571_v4 = vpop.permute.xlu0 %570 }
 0x659   :  { %v540_v60 = vmul.f32 0.03125, %v539_v59  ;;  %v566_v6 = vpop.permute.xlu1 %565 }
 0x65b   :  { %v541_v61 = vadd.f32 1e-05, %v540_v60 }
 0x65d   :  { %892 = vrsqrt.f32 %v541_v61 }
 0x667   :  { %v893_v62 = vpop.eup %892 }
 0x668   :  { %v544_v63 = vmul.f32 %v893_v62, %v528_v37  ;;  %v543_v2 = vmul.f32 %v893_v62, %v527_v39 }
 0x66a   :  { %v559_v3 = vmul.f32 %v556_v54, %v544_v63  ;;  %v558_v5 = vmul.f32 %v551_v53, %v543_v2 }
 0x66c   :  { %v574_v7 = vadd.f32 %v571_v4, %v559_v3  ;;  %v573_v8 = vadd.f32 %v566_v6, %v558_v5 }
 0x66e   :  { %649 = vrot.lane.b32.xlu1 %v573_v8, %s935_s4  ;;  %651 = vrot.lane.b32.xlu0 %v574_v7, %s935_s4 }
 0x6a1   :  { %v605_v9 = vpop.xlane.xlu1 %604  ;;  %v608_v10 = vpop.xlane.xlu0 %607 }
 0x6a2   :  { %v609_v11 = vsel %vm53_vm1, %v605_v9, 0.0  ;;  %v610_v12 = vsel %vm53_vm1, %v608_v10, 0.0 }
 0x6a3   :  { %v611_v13 = vadd.f32 %v610_v12, %v609_v11 }
 0x6a5   :  { %v612_v14 = vmul.f32 0.03125, %v611_v13  ;;  %v628_v17 = vpop.permute.xlu1 %627 }
 0x6a7   :  { %v613_v15 = vadd.f32 1e-05, %v612_v14 }
 0x6a9   :  { %894 = vrsqrt.f32 %v613_v15  ;;  %v623_v18 = vpop.permute.xlu0 %622  ;;  %v638_v23 = vpop.permute.xlu1 %637 }
 0x6ad   :  { %v643_v24 = vpop.permute.xlu0 %642 }
 0x6b3   :  { %v895_v16 = vpop.eup %894 }
 0x6b4   :  { %v616_v19 = vmul.f32 %v895_v16, %v1082_v30  ;;  %v615_v20 = vmul.f32 %v895_v16, %v1079_v29 }
 0x6b6   :  { %v631_v21 = vmul.f32 %v628_v17, %v616_v19  ;;  %v630_v22 = vmul.f32 %v623_v18, %v615_v20 }
 0x6b8   :  { %v646_v25 = vadd.f32 %v643_v24, %v631_v21  ;;  %v645_v26 = vadd.f32 %v638_v23, %v630_v22 }
 0x6e0   :  { %v650_v27 = vpop.permute.xlu1 %649  ;;  %v652_v28 = vpop.permute.xlu0 %651 }
 0x6e1   :  { %v655_v31 = vadd.f32 %v650_v27, %v645_v26  ;;  %v656_v32 = vadd.f32 %v652_v28, %v646_v25 }
 0x6e3   :  { %659 = vrot.lane.b32.xlu1 %v655_v31, %s929_s16  ;;  %661 = vrot.lane.b32.xlu0 %v656_v32, %s929_s16 }
 0x755   :  { %v660_v30 = vpop.permute.xlu1 %659  ;;  %v662_v33 = vpop.permute.xlu0 %661 }
 0x756   :  { %665 = vst.msk [vmem:[#allocation2] sm:$0xf] %vm222_vm3, %v660_v30  ;;  %666 = vst.msk [vmem:[#allocation2 + $0x4] sm:$0xf] %vm222_vm3, %v662_v33 }
 0x757   :  { %907 = shalt.err (!%p904_p4)
}
 0x758   :  { %s908_s16 = scalar_lea.hbm %s1148_s6, 128 }
 0x759   :  { %p909_p5 = scmp.ne.s32.totalorder %s1148_s6, %s908_s16  ;;  %p912_p6 = scmp.lt.u32.totalorder %s908_s16, %s1148_s6 }
 0x75b   :  { %p914_p7 = pnand %p912_p6, %p909_p5 }
 0x75d   :  { %917 = shalt.err (!%p914_p7)
}
 0x75e   :  { %s937_s22 = smov 64   ;;  %s938_s3 = smov 4  }
 0x75f   :  { %678 = dma.vmem_to_hbm [thread:$0]  %s673_s13, 128, %s1148_s6, [#allocation3], %s937_s22, %s937_s22, %s938_s3  }
 0x760   :  { %918 = dma.done.wait [#allocation3], 128  }
 0x761   :  { %919 = vsyncadd [#allocation3], 4294967168 }
 0x762   :  { %682 = vsyncpa [#allocation3], 1 }

</bundles_post_ra>
